<compile_context>
chip_gen: v7x
topology: tpu7x:2x2x1
jax: 0.10.0
libtpu: 0.0.40
codegen_flags: <defaults>
</compile_context>

<pallas_src>
import functools

import jax
import jax.numpy as jnp
from jax import lax
from jax.experimental import pallas as pl
from jax.experimental.pallas import tpu as pltpu

KH = KW = 3  # 3x3 conv, stride 1, padding 1 (representative encoder)


def ac_fused_kernel(p_ref, params_ref, inter_ref, cla_ref, val_ref,
                    *, k_pad, cout, ncls, inv_hw):
    """One grid step == one batch element (parallel across TCs on v7x).

    p_ref     : (K_pad, HW)   im2col patch slab for this batch element; row K
                              holds ones (encoder-bias fold), rest zero pad.
    params_ref: (PROW, PCOL)  all parameters packed into one slab:
                              [:, 0:k_pad]            encoder W (+bias column)
                              [:, k_pad:k_pad+cout]   decoder 1x1 W
                              [:, k_pad+cout]         decoder bias column
                              [:, k_pad+cout+1]       value-net weight column
                              [0, k_pad+cout+2]       value-net bias
    inter_ref : (Cout, HW)    encoder output (lane-dense)
    cla_ref   : (NCLS, HW)    decoder output (lane-dense)
    val_ref   : (1, 8, 128)   value-net output (scalar broadcast over tile)
    """
    o_wd = k_pad
    o_bd = o_wd + cout
    o_wv = o_bd + 1
    o_bv = o_wv + 1

    # Encoder: 3x3 conv as a single K_pad=40 im2col matmul on the MXU; bias is
    # folded into the matmul (ones-row / bias-column). ReLU on the VPU (f32).
    we = params_ref[:cout, 0:k_pad]                              # (Cout, K_pad)
    x_inter = jnp.dot(we, p_ref[...], preferred_element_type=jnp.float32)
    x_inter = jnp.maximum(x_inter, 0.0)                          # (Cout, HW)
    inter_ref[...] = x_inter

    # Decoder: 1x1 conv (classification head). `reverse` only affects the
    # backward pass (gradient reversal) -> identity here.
    wd = params_ref[:ncls, o_wd:o_bd]                            # (NCLS, Cout)
    bd = params_ref[:ncls, o_bd:o_bd + 1]                        # (NCLS, 1)
    cla_ref[...] = (
        jnp.dot(wd, x_inter, preferred_element_type=jnp.float32) + bd)

    # Value net: global average pool as a lane reduction (XLU) + tiny linear.
    pooled = jnp.sum(x_inter, axis=-1, keepdims=True) * inv_hw   # (Cout, 1)
    wv = params_ref[:cout, o_wv:o_wv + 1]                        # (Cout, 1)
    bv = params_ref[0:1, o_bv:o_bv + 1]                          # (1, 1)
    val = jnp.sum(wv * pooled, axis=0, keepdims=True) + bv       # (1, 1)
    val_ref[...] = jnp.broadcast_to(val.reshape(1, 1, 1), val_ref.shape)


def ac_model_forward(x_nchw, w_enc, b_enc, w_dec, b_dec, w_val, b_val,
                     reverse=False):
    """Pallas-backed forward of AC_model. Returns (x_cla, x_rl, x_inter)."""
    del reverse  # gradient-reversal flag: identity in the forward pass
    N, Cin, H, W = x_nchw.shape
    Cout = w_enc.shape[-1]
    NCLS = w_dec.shape[0]
    HW = H * W
    NHW = N * HW
    K = KH * KW * Cin
    K_pad = ((K + 1 + 7) // 8) * 8  # +1 bias row, rounded up to 8 sublanes

    # ---- XLA-side im2col: channel-major transpose FIRST so the stacked slab
    # reshapes straight to (K, NHW) with no post-stack transpose. -----------
    # TODO(synk): at production sizes move im2col into the kernel (channel-
    # major x + 9 (Cout, Cin) weight tiles, 9 accumulating matmuls on shifted/
    # masked views) so the 9x patch slab never round-trips HBM.
    x_pad = jnp.pad(x_nchw, ((0, 0), (0, 0), (1, 1), (1, 1)))
    x_cm = x_pad.transpose(1, 0, 2, 3)                       # (Cin, N, Hp, Wp)
    taps = [x_cm[:, :, kh:kh + H, kw:kw + W]
            for kh in range(KH) for kw in range(KW)]         # 9 x (Cin,N,H,W)
    patches = jnp.stack(taps, axis=0).reshape(K, NHW).astype(jnp.float32)
    patches = jnp.concatenate(
        [patches,
         jnp.ones((1, NHW), jnp.float32),                    # bias-fold row
         jnp.zeros((K_pad - K - 1, NHW), jnp.float32)],      # 8-align padding
        axis=0)                                              # (K_pad, NHW)

    # ---- one packed parameter slab (single DMA, single VMEM tile) ----------
    PROW = max(Cout, NCLS)
    PCOL = K_pad + Cout + 3
    w_enc2d = jnp.transpose(w_enc, (3, 0, 1, 2)).reshape(Cout, K)
    params = jnp.zeros((PROW, PCOL), jnp.float32)
    params = params.at[:Cout, 0:K].set(w_enc2d)
    params = params.at[:Cout, K].set(b_enc)                  # enc bias column
    params = params.at[:NCLS, K_pad:K_pad + Cout].set(w_dec)
    params = params.at[:NCLS, K_pad + Cout].set(b_dec)
    params = params.at[:Cout, K_pad + Cout + 1].set(w_val[0])
    params = params.at[0, K_pad + Cout + 2].set(b_val[0])

    kernel = functools.partial(ac_fused_kernel, k_pad=K_pad, cout=Cout,
                               ncls=NCLS, inv_hw=1.0 / HW)

    # NOTE: on v6e/v7x at production sizes, cast `patches` / weight slab to
    # bf16 at the matmul inputs (keep f32 accumulation + f32 VPU elementwise,
    # esp. on v5e) for 2x MXU / 0.5x DMA; kept f32 here for 1e-4 tolerance.
    inter, cla, val = pl.pallas_call(
        kernel,
        out_shape=(
            jax.ShapeDtypeStruct((Cout, NHW), jnp.float32),
            jax.ShapeDtypeStruct((NCLS, NHW), jnp.float32),
            jax.ShapeDtypeStruct((N, 8, 128), jnp.float32),
        ),
        grid=(N,),
        in_specs=[
            pl.BlockSpec((K_pad, HW), lambda n: (0, n)),     # per-batch slab
            pl.BlockSpec((PROW, PCOL), lambda n: (0, 0)),    # resident params
        ],
        out_specs=(
            pl.BlockSpec((Cout, HW), lambda n: (0, n)),
            pl.BlockSpec((NCLS, HW), lambda n: (0, n)),
            pl.BlockSpec((1, 8, 128), lambda n: (n, 0, 0)),
        ),
        compiler_params=pltpu.CompilerParams(
            dimension_semantics=("parallel",)),              # both TCs on v7x
    )(patches, params)

    # ---- back to PyTorch conventions (skip if the consumer accepts the
    # channel-major (C, N*H*W) layout directly). -----------------------------
    x_inter = inter.reshape(Cout, N, H, W).transpose(1, 0, 2, 3)  # (N,Cout,H,W)
    x_cla = cla.reshape(NCLS, N, H, W).transpose(1, 0, 2, 3)      # (N,NCLS,H,W)
    x_rl = val[:, 0, 0].reshape(N, 1)                             # (N,1)
    return x_cla, x_rl, x_inter


def reference_forward(x_nchw, w_enc, b_enc, w_dec, b_dec, w_val, b_val):
    """Pure-JAX reference (XLA conv) for correctness check."""
    w_oihw = jnp.transpose(w_enc, (3, 2, 0, 1))  # HWIO -> OIHW
    y = lax.conv_general_dilated(
        x_nchw, w_oihw, window_strides=(1, 1), padding="SAME",
        dimension_numbers=("NCHW", "OIHW", "NCHW"),
    )
    x_inter = jnp.maximum(y + b_enc[None, :, None, None], 0.0)
    x_cla = (jnp.einsum("dc,nchw->ndhw", w_dec, x_inter)
             + b_dec[None, :, None, None])
    pooled = jnp.mean(x_inter, axis=(2, 3))                        # (N, Cout)
    x_rl = pooled @ w_val.T + b_val[None, :]                       # (N, 1)
    return x_cla, x_rl, x_inter


if __name__ == "__main__":
    key = jax.random.PRNGKey(0)
    k_x, k_we, k_be, k_wd, k_bd, k_wv, k_bv = jax.random.split(key, 7)

    N, Cin, H, W = 2, 4, 16, 16
    Cout, NCLS = 8, 8

    x = jax.random.normal(k_x, (N, Cin, H, W), dtype=jnp.float32)

    # Deterministic init mimicking nn default (uniform in +-1/sqrt(fan_in)).
    fan_in = Cin * KH * KW
    bound = 1.0 / (fan_in ** 0.5)
    w_enc = jax.random.uniform(k_we, (KH, KW, Cin, Cout),
                               minval=-bound, maxval=bound, dtype=jnp.float32)
    b_enc = jax.random.uniform(k_be, (Cout,),
                               minval=-bound, maxval=bound, dtype=jnp.float32)

    hbound = 1.0 / (Cout ** 0.5)
    w_dec = jax.random.uniform(k_wd, (NCLS, Cout),
                               minval=-hbound, maxval=hbound, dtype=jnp.float32)
    b_dec = jax.random.uniform(k_bd, (NCLS,),
                               minval=-hbound, maxval=hbound, dtype=jnp.float32)
    w_val = jax.random.uniform(k_wv, (1, Cout),
                               minval=-hbound, maxval=hbound, dtype=jnp.float32)
    b_val = jax.random.uniform(k_bv, (1,),
                               minval=-hbound, maxval=hbound, dtype=jnp.float32)

    x_cla, x_rl, x_inter = jax.block_until_ready(
        ac_model_forward(x, w_enc, b_enc, w_dec, b_dec, w_val, b_val))

    cla_ref, rl_ref, inter_ref = jax.block_until_ready(
        reference_forward(x, w_enc, b_enc, w_dec, b_dec, w_val, b_val))

    assert x_inter.shape == (N, Cout, H, W), x_inter.shape
    assert x_cla.shape == (N, NCLS, H, W), x_cla.shape
    assert x_rl.shape == (N, 1), x_rl.shape
    assert jnp.allclose(x_inter, inter_ref, atol=1e-4, rtol=1e-4), float(
        jnp.max(jnp.abs(x_inter - inter_ref)))
    assert jnp.allclose(x_cla, cla_ref, atol=1e-4, rtol=1e-4), float(
        jnp.max(jnp.abs(x_cla - cla_ref)))
    assert jnp.allclose(x_rl, rl_ref, atol=1e-4, rtol=1e-4), float(
        jnp.max(jnp.abs(x_rl - rl_ref)))
    print("KERNEL_OK")
</pallas_src>

<mosaic_0001>
module attributes {stable_mosaic.version = 11 : i64} {
  func.func @ac_fused_kernel(%arg0: i32, %arg1: memref<40x256xf32, #tpu.memory_space<vmem>>, %arg2: memref<8x51xf32, #tpu.memory_space<vmem>>, %arg3: memref<8x256xf32, #tpu.memory_space<vmem>>, %arg4: memref<8x256xf32, #tpu.memory_space<vmem>>, %arg5: memref<1x8x128xf32, #tpu.memory_space<vmem>>) attributes {dimension_semantics = [#tpu.dimension_semantics<parallel>], iteration_bounds = array<i64: 2>, scalar_prefetch = 0 : i64, scratch_operands = 0 : i64, tpu.core_type = #tpu.core_type<tc>, window_params = [{transform_indices = @transform_0, window_bounds = array<i64: 40, 256>}, {pipeline_mode = #tpu.pipeline_mode<synchronous>, transform_indices = @transform_1, window_bounds = array<i64: 8, 51>}, {transform_indices = @transform_2, window_bounds = array<i64: 8, 256>}, {transform_indices = @transform_3, window_bounds = array<i64: 8, 256>}, {transform_indices = @transform_4, window_bounds = array<i64: 1, 8, 128>}]} {
    %c0 = arith.constant 0 : index
    %c0_0 = arith.constant 0 : index
    %0 = vector.load %arg2[%c0, %c0_0] : memref<8x51xf32, #tpu.memory_space<vmem>>, vector<8x40xf32>
    %c0_1 = arith.constant 0 : index
    %c0_2 = arith.constant 0 : index
    %1 = vector.load %arg1[%c0_1, %c0_2] : memref<40x256xf32, #tpu.memory_space<vmem>>, vector<40x256xf32>
    %cst = arith.constant dense<0.000000e+00> : vector<8x256xf32>
    %2 = tpu.matmul %0, %1, %cst {dimension_numbers = #tpu.dot_dimension_numbers<[1], [0], [0], [1], [0, 0, 1, 1], [], []>} : vector<8x40xf32>, vector<40x256xf32>, vector<8x256xf32> -> vector<8x256xf32>
    %cst_3 = arith.constant 0.000000e+00 : f32
    %3 = vector.broadcast %cst_3 : f32 to vector<8x256xf32>
    %4 = arith.maximumf %2, %3 : vector<8x256xf32>
    %c0_4 = arith.constant 0 : index
    %c0_5 = arith.constant 0 : index
    %5 = vector.load %arg3[%c0_4, %c0_5] : memref<8x256xf32, #tpu.memory_space<vmem>>, vector<8x256xf32>
    tpu.vector_store %arg3[%c0_4, %c0_5], %4 {strides = array<i32>} : memref<8x256xf32, #tpu.memory_space<vmem>>, vector<8x256xf32>,
    %c0_6 = arith.constant 0 : index
    %c40 = arith.constant 40 : index
    %6 = vector.load %arg2[%c0_6, %c40] : memref<8x51xf32, #tpu.memory_space<vmem>>, vector<8x8xf32>
    %c0_7 = arith.constant 0 : index
    %c48 = arith.constant 48 : index
    %7 = vector.load %arg2[%c0_7, %c48] : memref<8x51xf32, #tpu.memory_space<vmem>>, vector<8x1xf32>
    %cst_8 = arith.constant dense<0.000000e+00> : vector<8x256xf32>
    %8 = tpu.matmul %6, %4, %cst_8 {dimension_numbers = #tpu.dot_dimension_numbers<[1], [0], [0], [1], [0, 0, 1, 1], [], []>} : vector<8x8xf32>, vector<8x256xf32>, vector<8x256xf32> -> vector<8x256xf32>
    %9 = vector.broadcast %7 : vector<8x1xf32> to vector<8x256xf32>
    %10 = arith.addf %8, %9 : vector<8x256xf32>
    %c0_9 = arith.constant 0 : index
    %c0_10 = arith.constant 0 : index
    %11 = vector.load %arg4[%c0_9, %c0_10] : memref<8x256xf32, #tpu.memory_space<vmem>>, vector<8x256xf32>
    tpu.vector_store %arg4[%c0_9, %c0_10], %10 {strides = array<i32>} : memref<8x256xf32, #tpu.memory_space<vmem>>, vector<8x256xf32>,
    %cst_11 = arith.constant dense<0.000000e+00> : vector<8xf32>
    %12 = vector.multi_reduction <add>, %4, %cst_11 [1] : vector<8x256xf32> to vector<8xf32>
    %13 = vector.shape_cast %12 : vector<8xf32> to vector<8x1xf32>
    %cst_12 = arith.constant 3.906250e-03 : f32
    %14 = vector.broadcast %cst_12 : f32 to vector<8x1xf32>
    %15 = arith.mulf %13, %14 : vector<8x1xf32>
    %c0_13 = arith.constant 0 : index
    %c49 = arith.constant 49 : index
    %16 = vector.load %arg2[%c0_13, %c49] : memref<8x51xf32, #tpu.memory_space<vmem>>, vector<8x1xf32>
    %c0_14 = arith.constant 0 : index
    %c50 = arith.constant 50 : index
    %17 = vector.load %arg2[%c0_14, %c50] : memref<8x51xf32, #tpu.memory_space<vmem>>, vector<1x1xf32>
    %18 = arith.mulf %16, %15 : vector<8x1xf32>
    %cst_15 = arith.constant dense<0.000000e+00> : vector<1xf32>
    %19 = vector.multi_reduction <add>, %18, %cst_15 [0] : vector<8x1xf32> to vector<1xf32>
    %20 = vector.shape_cast %19 : vector<1xf32> to vector<1x1xf32>
    %21 = arith.addf %20, %17 : vector<1x1xf32>
    %22 = vector.shape_cast %21 : vector<1x1xf32> to vector<1x1x1xf32>
    %23 = vector.shape_cast %22 : vector<1x1x1xf32> to vector<1x1x1xf32>
    %24 = vector.broadcast %23 : vector<1x1x1xf32> to vector<1x8x128xf32>
    %c0_16 = arith.constant 0 : index
    %c0_17 = arith.constant 0 : index
    %c0_18 = arith.constant 0 : index
    %25 = vector.load %arg5[%c0_16, %c0_17, %c0_18] : memref<1x8x128xf32, #tpu.memory_space<vmem>>, vector<1x8x128xf32>
    tpu.vector_store %arg5[%c0_16, %c0_17, %c0_18], %24 {strides = array<i32>} : memref<1x8x128xf32, #tpu.memory_space<vmem>>, vector<1x8x128xf32>,
    return
  }
  func.func @transform_0(%arg0: i32) -> (i32, i32) {
    %c0_i32 = arith.constant 0 : i32
    %c0_i32_0 = arith.constant 0 : i32
    return %c0_i32, %arg0 : i32, i32
  }
  func.func @transform_1(%arg0: i32) -> (i32, i32) {
    %c0_i32 = arith.constant 0 : i32
    %c0_i32_0 = arith.constant 0 : i32
    %c0_i32_1 = arith.constant 0 : i32
    return %c0_i32, %c0_i32_0 : i32, i32
  }
  func.func @transform_2(%arg0: i32) -> (i32, i32) {
    %c0_i32 = arith.constant 0 : i32
    %c0_i32_0 = arith.constant 0 : i32
    return %c0_i32, %arg0 : i32, i32
  }
  func.func @transform_3(%arg0: i32) -> (i32, i32) {
    %c0_i32 = arith.constant 0 : i32
    %c0_i32_0 = arith.constant 0 : i32
    return %c0_i32, %arg0 : i32, i32
  }
  func.func @transform_4(%arg0: i32) -> (i32, i32, i32) {
    %c0_i32 = arith.constant 0 : i32
    %c0_i32_0 = arith.constant 0 : i32
    %c0_i32_1 = arith.constant 0 : i32
    return %arg0, %c0_i32, %c0_i32_0 : i32, i32, i32
  }
}

</mosaic_0001>

<bundles_post_ra>
// kernel: tpu_custom_call.1
= control target key start
LH: loop header
LB: loop body
LE: loop exit
PB: predicated region body
PF: predicated region fallthrough
CT: control target
= control target key end

     0   :  { %10 = vsyncpa [#allocation3], 0  ;;  %s1258_s0 = inlined_call_operand.hbm [shape: f32[40,512], index: 0, kind: input, shape index: {}]   ;;  %s1259_s1 = inlined_call_operand.hbm [shape: f32[8,51], index: 1, kind: input, shape index: {}]   ;;  %s1260_s2 = inlined_call_operand.hbm [shape: f32[8,512], index: 2, kind: output, shape index: {0}]   ;;  %s1261_s3 = inlined_call_operand.hbm [shape: f32[8,512], index: 3, kind: output, shape index: {1}]   ;;  %s1262_s4 = inlined_call_operand.hbm [shape: f32[2,8,128], index: 4, kind: output, shape index: {2}]  }
   0x1   :  { %12 = vsyncpa [#allocation3 + $0x1], 0 }
   0x2   :  { %13 = vsyncpa [#allocation6], 0 }
   0x3   :  { %14 = vsyncpa [#allocation4], 0 }
   0x4   :  { %16 = vsyncpa [#allocation4 + $0x1], 0 }
   0x5   :  { %17 = vsyncpa [#allocation9], 0 }
   0x6   :  { %19 = vsyncpa [#allocation9 + $0x1], 0  ;;  %s987_s15 = smov 0   ;;  %s989_s16 = smov 0  }
   0x7   :  { %s991_s17 = smov 0   ;;  %s993_s18 = smov 0  }
   0x8 LB: > { %s1008_s19 = sadd.s32 4294967295, %s947_s18   ;;  %s644_s20 = sadd.s32 4294967294, %s947_s18   ;;  %s947_s18 = sphi %s993_s18, %s1287_s18   ;;  %s943_s17 = sphi %s991_s17, %s1286_s17   ;;  %s939_s16 = sphi %s989_s16, %s1285_s16   ;;  %s935_s15 = sphi %s987_s15, %s1284_s15  }
   0x9   : > { %s1012_s21 = sadd.s32 1, %s947_s18   ;;  %s32_s22 = sadd.s32 1, %s943_s17 }
   0xa   : > { %s29_s23 = ssub.s32 %s947_s18, %s1012_s21  ;;  %p39_p0 = scmp.ne.s32.totalorder %s943_s17, %s939_s16 }
   0xb   : > { %p30_p1 = scmp.eq.s32.totalorder %s29_s23, 0  ;;  %p40_p2 = scmp.eq.s32.totalorder %s947_s18, 0 }
   0xc   : > { %p45_p3 = scmp.ne.s32.totalorder %s939_s16, %s935_s15  ;;  %p1263_p4 = scmp.eq.s32.totalorder %s1008_s19, 0 }
   0xd   : > { %s1024_s24 = scalar_select %p30_p1, %s943_s17, %s32_s22  }
   0xe   : > { %p1026_p5 = por %p40_p2, %p39_p0  ;;  %p1032_p6 = por %p1263_p4, %p45_p3 }
   0xf   : > { %p90_p7 = scmp.eq.s32.totalorder %s1008_s19, 1  ;;  %p96_p8 = scmp.eq.s32.totalorder %s644_s20, 1 }
  0x10   : > { %s1269_s26 = scalar_select %p1032_p6, 1, 0 }
  0x11   : > { %p645_p9 = scmp.ge.s32.totalorder %s947_s18, 1  ;;  %p155_p10 = scmp.lt.s32.totalorder %s947_s18, 3 }
  0x12   : > { %p1041_p11 = por %p90_p7, %p39_p0  ;;  %p1045_p12 = por %p96_p8, %p45_p3 }
  0x13   : > { %p1049_p13 = pnand %p645_p9, %p155_p10  ;;  %s949_s30 = smov [#allocation5]  }
  0x14   : > { %s1270_s27 = scalar_select %p1041_p11, 1, 0 }
  0x15   : > { %s1271_s28 = scalar_select %p1045_p12, 1, 0 }
  0x16   : > { %s1272_s29 = scalar_select %p1049_p13, 1, 0 }
  0x17   : > { %p694_p2 = pneg %p1049_p13  ;;  %s168_s5 = sshll.u32 %s949_s30, 4  ;;  %s169_s5 = int_to_ptr.vmem [resolvable:$true] %s168_s5 }
  0x18   : > { %p713_p4 = scmp.lt.s32.totalorder %s947_s18, 2  ;;  %p1273_p0 = scmp.eq.s32.totalorder %s1008_s19, 0 }
  0x19   : > { %s179_s7 = sand.u32 1, %s943_s17   ;;  %s759_s12 = scalar_lea.hbm %s1259_s1, 128 }
  0x1a   : > { %p1059_p7 = pnand %p694_p2, %p1273_p0  ;;  %p1066_p3 = pnand %p713_p4, %p1026_p5 }
  0x1b   : > { %s678_s9 = smul.u32 80, %s179_s7  ;;  %p760_p8 = scmp.ne.s32.totalorder %s1259_s1, %s759_s12 }
  0x1c   : > { %s1275_s8 = scalar_select %p1066_p3, 1, 0 }
  0x1d   : > { %p761_p9 = pneg %p1059_p7  ;;  %p766_p4 = scmp.lt.u32.totalorder %s759_s12, %s1259_s1 }
  0x1f   : > { %p762_p10 = pnand %p761_p9, %p760_p8 }
  0x21   : > { %p763_p2 = pneg %p762_p10 }
  0x23   : > { %p768_p5 = pnand %p766_p4, %p763_p2 }
  0x25   : > { %771 = shalt.err (!%p768_p5)
}
  0x26   : > { %s772_s25 = scalar_lea.vmem %s169_s5, 128  ;;  %p780_p11 = scmp.lt.s32.totalorder %s169_s5, %s169_s5 }
  0x27   : > { %p773_p0 = scmp.ne.s32.totalorder %s169_s5, %s772_s25  ;;  %p781_p6 = scmp.lt.s32.totalorder %s772_s25, %s772_s25 }
  0x29   : > { %p775_p1 = pnand %p773_p0, %p761_p9  ;;  %p782_p13 = por %p781_p6, %p780_p11 }
  0x2b   : > { %p776_p12 = pneg %p775_p1 }
  0x2d   : > { %p783_p3 = pnand %p782_p13, %p776_p12 }
  0x2f   : > { %786 = shalt.err (!%p783_p3)
}
  0x30   : > { %697 = dma.hbm_to_vmem [thread:$0]  (!%p1059_p7), %s1259_s1, 128, %s169_s5, [#allocation6]  }
  0x31   : > { %s667_s11 = sshll.u32 %s947_s18, 8  ;;  %s183_s12 = scalar_lea.vmem [#allocation2], %s678_s9 }
  0x32   : > { %s190_s13 = sshll.u32 %s183_s12, 4  ;;  %s1090_s23 = scalar_lea.hbm %s1258_s0, %s667_s11  ;;  %s1092_s13 = int_to_ptr.vmem [resolvable:$true] %s190_s13 }
  0x33   : > { %s1094_s6 = scalar_lea.sflag [#allocation3], %s179_s7  ;;  %s787_s25 = scalar_lea.hbm %s1090_s23, 1280 }
  0x34   : > { %p788_p6 = scmp.ne.s32.totalorder %s1090_s23, %s787_s25  ;;  %p1276_p11 = scmp.ne.s32.totalorder %s1275_s8, 0 }
  0x35   : > { %s792_s30 = scalar_lea.hbm %s1258_s0, 2560  ;;  %p793_p7 = scmp.lt.u32.totalorder %s1090_s23, %s1258_s0 }
  0x36   : > { %p789_p12 = pneg %p1276_p11  ;;  %p794_p3 = scmp.lt.u32.totalorder %s792_s30, %s787_s25 }
  0x37   : > { %p796_p9 = scmp.lt.u32.totalorder %s787_s25, %s1090_s23 }
  0x38   : > { %p790_p13 = pnand %p789_p12, %p788_p6  ;;  %p795_p8 = por %p794_p3, %p793_p7 }
  0x3a   : > { %p791_p1 = pneg %p790_p13  ;;  %p797_p10 = por %p796_p9, %p795_p8 }
  0x3c   : > { %p798_p2 = pnand %p797_p10, %p791_p1 }
  0x3e   : > { %801 = shalt.err (!%p798_p2)
}
  0x3f   : > { %s802_s7 = scalar_lea.vmem %s1092_s13, 1280  ;;  %s950_s12 = smov [#allocation2]  }
  0x40   : > { %p803_p4 = scmp.ne.s32.totalorder %s1092_s13, %s802_s7  ;;  %s807_s14 = sshll.u32 %s950_s12, 4  ;;  %s808_s14 = int_to_ptr.vmem [resolvable:$false] %s807_s14 }
  0x41   : > { %s809_s22 = scalar_lea.vmem %s808_s14, 2560  ;;  %p810_p6 = scmp.lt.s32.totalorder %s1092_s13, %s808_s14 }
  0x42   : > { %p805_p5 = pnand %p803_p4, %p789_p12  ;;  %p811_p13 = scmp.lt.s32.totalorder %s809_s22, %s802_s7 }
  0x44   : > { %p806_p0 = pneg %p805_p5  ;;  %p812_p7 = por %p811_p13, %p810_p6 }
  0x46   : > { %p813_p3 = pnand %p812_p7, %p806_p0 }
  0x48   : > { %816 = shalt.err (!%p813_p3)
}
  0x49   : > { %s951_s25 = smov 512   ;;  %s952_s5 = smov 256  }
  0x4a   : > { %s953_s9 = smov 16   ;;  %p1277_p12 = scmp.ne.s32.totalorder %s1272_s29, 0 }
  0x4b   : > { %701 = dma.hbm_to_vmem [thread:$0]  (!%p1276_p11), %s1090_s23, 1280, %s1092_s13, %s1094_s6, %s951_s25, %s952_s5, %s953_s9  }
  0x4c   : > { %202 = sbr.rel (%p1277_p12) target bundleno = 658 (0x292), region = 28  ;;  %s1125_s30 = sand.u32 (!%p1277_p12), 1, %s939_s16  }
  0x4d   : > { %s679_s10 = smul.u32 (!%p1277_p12), 80, %s1125_s30  ;;  %s205_s11 = scalar_lea.sflag (!%p1277_p12), [#allocation3], %s1125_s30 }
  0x4e   : > { %p1278_p1 = scmp.ne.s32.totalorder (!%p1277_p12), %s1269_s26, 0 }
  0x4f   : > { %s208_s7 = scalar_lea.vmem (!%p1277_p12), [#allocation2], %s679_s10 }
  0x53   : > { %918 = dma.done.wait (%p1278_p1), %s205_s11, 1280  }
  0x54   : > { %920 = vsyncadd (%p1278_p1), %s205_s11, 4294966016  ;;  %p1279_p8 = scmp.eq.s32.totalorder %s1008_s19, 0 }
  0x56   : > { %922 = dma.done.wait (%p1279_p8), [#allocation6], 128   ;;  %p1280_p11 = pmov %p1279_p8 }
  0x57   : > { %v954_v0 = vmov 0.0   ;;  %v252_v1 = vld [vmem:[%s208_s7 + $0x8] sm:$0xff]  ;;  %v254_v2 = vld [vmem:[%s208_s7 + $0x18] sm:$0xff]  ;;  %v251_v3 = vld [vmem:[%s208_s7] sm:$0xff]  ;;  %s955_s26 = smov 88   ;;  %vm261_vm0 = vcmask 326656  }
  0x58   : > { %924 = vsyncadd (%p1280_p11), [#allocation6], 4294967168  ;;  %329 = vmatprep.mubr.f32.mxu0 %v954_v0  ;;  %415 = vmatprep.mubr.f32.mxu1 %v954_v0  ;;  %v670_v4 = vpack.c.bf16 %v254_v2, %v252_v1  ;;  %v253_v5 = vld [vmem:[%s208_s7 + $0x10] sm:$0xff]  ;;  %v256_v6 = vld [vmem:[%s208_s7 + $0x28] sm:$0xff]  ;;  %s956_s29 = smov 127   ;;  %s652_s8 = sshll.u32 %s1125_s30, 4 }
  0x59   : > { %v258_v7 = vld [vmem:[%s208_s7 + $0x38] sm:$0xff]  ;;  %v672_v8 = vpack.c.bf16 %v253_v5, %v251_v3  ;;  %v255_v10 = vld [vmem:[%s208_s7 + $0x20] sm:$0xff]  ;;  %v257_v11 = vld [vmem:[%s208_s7 + $0x30] sm:$0xff]  ;;  %s1140_s13 = scalar_lea.vmem [#allocation7], %s652_s8  ;;  %vm348_vm1 = vcmask 64512   ;;  %v957_v23 = vmov 48  }
  0x5a   : > { %v674_v9 = vpack.c.bf16 %v258_v7, %v256_v6  ;;  %671 = vmatprep.subr.bf16.mxu0 %v670_v4  ;;  %v250_v12 = vld [vmem:[#allocation5] sm:$0xff]  ;;  %v676_v13 = vpack.c.bf16 %v257_v11, %v255_v10  ;;  %v260_v14 = vld [vmem:[%s208_s7 + $0x48] sm:$0xff]  ;;  %757 = vset.pattern.permute.xlu1 %v957_v23  ;;  %vm431_vm2 = vcmask 408968   ;;  %s958_s23 = smov 79   ;;  %s668_s6 = sshll.u32 %s1008_s19, 8 }
  0x5b   : > { %673 = vmatpush1.bf16.msra.mxu0 %v672_v8  ;;  %346 = vrot.lane.b32.xlu0 %v250_v12, %s955_s26  ;;  %v259_v15 = vld [vmem:[%s208_s7 + $0x40] sm:$0xff]  ;;  %s1150_s22 = scalar_lea.hbm %s1260_s2, %s668_s6  ;;  %s476_s25 = sshll.u32 %s1140_s13, 4  ;;  %s477_s25 = int_to_ptr.vmem [resolvable:$true] %s476_s25 }
  0x5c   : > { %675 = vmatprep.subr.bf16.mxu0 %v674_v9  ;;  %v429_v16 = vld [vmem:[#allocation5] sm:$0x1]  ;;  %758 = vset.pattern.permute.xlu0 %v957_v23  ;;  %s452_s5 = scalar_lea.sflag [#allocation4], %s1125_s30  ;;  %s817_s9 = scalar_lea.vmem %s477_s25, 256 }
  0x5d   : > { %440 = vrot.lane.b32.xlu1 %v429_v16, %s956_s29  ;;  %p818_p9 = scmp.ne.s32.totalorder %s477_s25, %s817_s9  ;;  %p1281_p10 = scmp.ne.s32.totalorder %s1270_s27, 0 }
  0x5e   : > { %s959_s10 = smov [#allocation7]  }
  0x5f   : > { %677 = vmatpush1.bf16.msra.mxu0 %v676_v13  ;;  %p819_p2 = pnand %p818_p9, %p1281_p10  ;;  %s821_s11 = sshll.u32 %s959_s10, 4  ;;  %s822_s11 = int_to_ptr.vmem [resolvable:$false] %s821_s11 }
  0x60   : > { %273 = vmatprep.subr.mxu0 %v260_v14  ;;  %s823_s7 = scalar_lea.vmem %s822_s11, 512  ;;  %p824_p5 = scmp.lt.s32.totalorder %s477_s25, %s822_s11 }
  0x61   : > { %p820_p4 = pneg %p819_p2  ;;  %p825_p0 = scmp.lt.s32.totalorder %s823_s7, %s817_s9 }
  0x63   : > { %274 = vmatpush1.msra.mxu0 %v259_v15  ;;  %p826_p6 = por %p825_p0, %p824_p5 }
  0x64   : > { %655 = vmatmul.mubr.msk.f32.vlgmr.msra.gmra.mrb[0].mxu0 %vm261_vm0, %v250_v12 }
  0x65   : > { %p827_p13 = pnand %p826_p6, %p820_p4 }
  0xcd   : > { %v347_v21 = vpop.permute.xlu0 %346 }
  0xcf   : > { %v441_v33 = vpop.permute.xlu1 %440 }
 0x137   : > { %v331_v17 = vpop.f32.mrb[0].mxu0 }
 0x138   : > { %v336_v18 = vmax.f32 %v331_v17, 0.0  ;;  %v333_v19 = vpop.f32.mrb[1].mxu0 }
 0x139   : > { %v337_v20 = vmax.f32 %v333_v19, 0.0 }
 0x13a   : > { %338 = vst [vmem:[%s1140_s13] sm:$0xff] %v336_v18 }
 0x13b   : > { %339 = vst [vmem:[%s1140_s13 + $0x8] sm:$0xff] %v337_v20  ;;  %351 = vmatprep.subr.mxu1 %v337_v20  ;;  %v424_v22 = vadd.f32 %v337_v20, %v336_v18 }
 0x13c   : > { %352 = vmatpush1.msra.mxu1 %v336_v18 }
 0x13d   : > { %425 = vadd.xlane.f32.xlu0 %v424_v22  ;;  %656 = vmatmul.mubr.msk.f32.vlgmr.msra.gmra.mrb[0].mxu1 %vm348_vm1, %v347_v21 }
 0x1ca   : > { %v426_v24 = vpop.xlane.xlu0 %425 }
 0x1cb   : > { %v427_v25 = vmul.f32 0.00390625, %v426_v24 }
 0x1cd   : > { %v430_v26 = vmul.f32 %v427_v25, %v250_v12 }
 0x1cf   : > { %v432_v27 = vsel %vm431_vm2, %v430_v26, 0.0 }
 0x1d0   : > { %v433_v28 = vrot.slane %v432_v27, 4 }
 0x1d2   : > { %v434_v29 = vadd.f32 %v433_v28, %v432_v27 }
 0x1d4   : > { %v435_v30 = vrot.slane %v434_v29, 2 }
 0x1d6   : > { %v436_v31 = vadd.f32 %v435_v30, %v434_v29 }
 0x1d8   : > { %v437_v32 = vrot.slane %v436_v31, 1 }
 0x1da   : > { %v438_v34 = vadd.f32 %v437_v32, %v436_v31 }
 0x1dc   : > { %v443_v35 = vadd.f32 %v441_v33, %v438_v34 }
 0x1de   : > { %445 = vrot.lane.b32.xlu1 %v443_v35, %s958_s23 }
 0x1e2   : > { %343 = vperm.xlu1 %757, %v250_v12  }
 0x1e3   : > { %830 = shalt.err (!%p827_p13)
}
 0x1e4   : > { %s831_s26 = scalar_lea.hbm %s1150_s22, 256  ;;  %s835_s23 = scalar_lea.hbm %s1260_s2, 512 }
 0x1e5   : > { %p832_p7 = scmp.ne.s32.totalorder %s1150_s22, %s831_s26  ;;  %p836_p1 = scmp.lt.u32.totalorder %s1150_s22, %s1260_s2 }
 0x1e6   : > { %p837_p8 = scmp.lt.u32.totalorder %s835_s23, %s831_s26  ;;  %p839_p9 = scmp.lt.u32.totalorder %s831_s26, %s1150_s22 }
 0x1e7   : > { %p833_p3 = pnand %p832_p7, %p1281_p10 }
 0x1e8   : > { %p838_p11 = por %p837_p8, %p836_p1 }
 0x1e9   : > { %p834_p12 = pneg %p833_p3 }
 0x1ea   : > { %p840_p2 = por %p839_p9, %p838_p11 }
 0x1ec   : > { %p841_p4 = pnand %p840_p2, %p834_p12 }
 0x1ee   : > { %844 = shalt.err (!%p841_p4)
}
 0x1ef   : > { %688 = dma.vmem_to_hbm [thread:$0]  (%p1281_p10), %s477_s25, 256, %s1150_s22, %s452_s5  }
 0x1f0   : > { %s456_s9 = sand.u32 1, %s1008_s19   ;;  %s239_s10 = scalar_lea.vmem [#allocation8], %s652_s8 }
 0x1f1   : > { %s490_s11 = sshll.u32 %s239_s10, 4  ;;  %s1179_s29 = scalar_lea.hbm %s1261_s3, %s668_s6  ;;  %s1181_s11 = int_to_ptr.vmem [resolvable:$true] %s490_s11 }
 0x1f2   : > { %s1183_s22 = scalar_lea.sflag [#allocation9], %s456_s9  ;;  %s845_s8 = scalar_lea.vmem %s1181_s11, 256 }
 0x1f3   : > { %p846_p5 = scmp.ne.s32.totalorder %s1181_s11, %s845_s8  ;;  %s960_s25 = smov [#allocation8]  }
 0x1f4   : > { %s849_s5 = sshll.u32 %s960_s25, 4  ;;  %s850_s5 = int_to_ptr.vmem [resolvable:$false] %s849_s5 }
 0x1f5   : > { %p847_p0 = pnand %p846_p5, %p1281_p10  ;;  %s851_s13 = scalar_lea.vmem %s850_s5, 512 }
 0x1f6   : > { %p852_p13 = scmp.lt.s32.totalorder %s1181_s11, %s850_s5  ;;  %p853_p7 = scmp.lt.s32.totalorder %s851_s13, %s845_s8 }
 0x1f7   : > { %p848_p6 = pneg %p847_p0 }
 0x1f8   : > { %p854_p3 = por %p853_p7, %p852_p13 }
 0x1fa   : > { %p855_p12 = pnand %p854_p3, %p848_p6 }
 0x210   : > { %v417_v36 = vpop.f32.mrb[0].mxu1 }
 0x211   : > { %v419_v37 = vpop.f32.mrb[1].mxu1 }
 0x250   : > { %v446_v38 = vpop.permute.xlu1 %445 }
 0x251   : > { %680 = vpush %v446_v38 }
 0x261   : > { %v344_v39 = vpop.permute.xlu1 %343 }
 0x262   : > { %v418_v40 = vadd.f32 %v417_v36, %v344_v39  ;;  %v420_v41 = vadd.f32 %v419_v37, %v344_v39 }
 0x264   : > { %422 = vst [vmem:[%s239_s10] sm:$0xff] %v418_v40  ;;  %423 = vst [vmem:[%s239_s10 + $0x8] sm:$0xff] %v420_v41 }
 0x265   : > { %858 = shalt.err (!%p855_p12)
}
 0x266   : > { %s859_s6 = scalar_lea.hbm %s1179_s29, 256  ;;  %s863_s14 = scalar_lea.hbm %s1261_s3, 512 }
 0x267   : > { %p860_p1 = scmp.ne.s32.totalorder %s1179_s29, %s859_s6  ;;  %p864_p9 = scmp.lt.u32.totalorder %s1179_s29, %s1261_s3 }
 0x268   : > { %p865_p2 = scmp.lt.u32.totalorder %s863_s14, %s859_s6  ;;  %p867_p5 = scmp.lt.u32.totalorder %s859_s6, %s1179_s29 }
 0x269   : > { %p861_p8 = pnand %p860_p1, %p1281_p10 }
 0x26a   : > { %p866_p4 = por %p865_p2, %p864_p9 }
 0x26b   : > { %p862_p11 = pneg %p861_p8 }
 0x26c   : > { %p868_p0 = por %p867_p5, %p866_p4 }
 0x26e   : > { %p869_p6 = pnand %p868_p0, %p862_p11 }
 0x270   : > { %872 = shalt.err (!%p869_p6)
}
 0x271   : > { %689 = dma.vmem_to_hbm [thread:$0]  (%p1281_p10), %s1181_s11, 256, %s1179_s29, %s1183_s22  }
 0x272   : > { %s654_s7 = sshll.u32 %s1125_s30, 3  ;;  %s664_s25 = sshll.u32 %s1008_s19, 7 }
 0x273   : > { %s246_s26 = scalar_lea.vmem [#allocation10], %s654_s7  ;;  %s1214_s23 = scalar_lea.hbm %s1262_s4, %s664_s25 }
 0x274   : > { %s503_s8 = sshll.u32 %s246_s26, 4  ;;  %s961_s30 = smov [#allocation10]   ;;  %s1209_s8 = int_to_ptr.vmem [resolvable:$true] %s503_s8 }
 0x275   : > { %s873_s12 = scalar_lea.vmem %s1209_s8, 128  ;;  %s877_s19 = sshll.u32 %s961_s30, 4  ;;  %s878_s19 = int_to_ptr.vmem [resolvable:$false] %s877_s19 }
 0x276   : > { %p874_p13 = scmp.ne.s32.totalorder %s1209_s8, %s873_s12  ;;  %s879_s11 = scalar_lea.vmem %s878_s19, 256 }
 0x277   : > { %p880_p12 = scmp.lt.s32.totalorder %s1209_s8, %s878_s19  ;;  %p881_p1 = scmp.lt.s32.totalorder %s879_s11, %s873_s12 }
 0x278   : > { %p875_p7 = pnand %p874_p13, %p1281_p10 }
 0x279   : > { %p882_p8 = por %p881_p1, %p880_p12 }
 0x27a   : > { %p876_p3 = pneg %p875_p7 }
 0x27c   : > { %p883_p11 = pnand %p882_p8, %p876_p3 }
 0x282   : > { %s681_s5 = spop %680 }
 0x283   : > { %v448_v42 = vstv %s681_s5 }
 0x284   : > { %450 = vst [vmem:[%s246_s26] sm:$0xff] %v448_v42 }
 0x285   : > { %886 = shalt.err (!%p883_p11)
}
 0x286   : > { %s887_s29 = scalar_lea.hbm %s1214_s23, 128  ;;  %s891_s10 = scalar_lea.hbm %s1262_s4, 256 }
 0x287   : > { %p888_p9 = scmp.ne.s32.totalorder %s1214_s23, %s887_s29  ;;  %p892_p5 = scmp.lt.u32.totalorder %s1214_s23, %s1262_s4 }
 0x288   : > { %p893_p0 = scmp.lt.u32.totalorder %s891_s10, %s887_s29  ;;  %p895_p13 = scmp.lt.u32.totalorder %s887_s29, %s1214_s23 }
 0x289   : > { %p889_p2 = pnand %p888_p9, %p1281_p10 }
 0x28a   : > { %p894_p6 = por %p893_p0, %p892_p5 }
 0x28b   : > { %p890_p4 = pneg %p889_p2 }
 0x28c   : > { %p896_p7 = por %p895_p13, %p894_p6 }
 0x28e   : > { %p897_p3 = pnand %p896_p7, %p890_p4 }
 0x290   : > { %900 = shalt.err (!%p897_p3)
}
 0x291   : > { %690 = dma.vmem_to_hbm [thread:$0]  (%p1281_p10), %s1209_s8, 128, %s1214_s23, %s1183_s22  }
 0x292 PF: > { %s515_s25 = sand.u32 1, %s935_s15   ;;  %p1282_p12 = scmp.ne.s32.totalorder %s1271_s28, 0 }
 0x293   : > { %p1283_p1 = scmp.ge.s32.totalorder %s947_s18, 2  ;;  %s516_s5 = scalar_lea.sflag [#allocation4], %s515_s25 }
 0x295   : > { %p703_p8 = pnand %p1283_p1, %p1282_p12 }
 0x297   : > { %926 = dma.done.wait (!%p703_p8), %s516_s5, 256  }
 0x298   : > { %928 = vsyncadd (!%p703_p8), %s516_s5, 4294967040  ;;  %s524_s13 = sand.u32 1, %s644_s20  }
 0x299   : > { %s525_s6 = scalar_lea.sflag [#allocation9], %s524_s13 }
 0x29a   : > { %930 = dma.done.wait (!%p703_p8), %s525_s6, 384  }
 0x29b   : > { %932 = vsyncadd (!%p703_p8), %s525_s6, 4294966912  ;;  %p22_p10 = scmp.ge.s32.totalorder %s1012_s21, 4   ;;  %s1284_s15 = smov %s939_s16 }
 0x29c   : > { %s1285_s16 = smov %s943_s17  ;;  %s1286_s17 = smov %s1024_s24 }
 0x29d   : > { %s1287_s18 = smov %s1012_s21  ;;  %24 = sbr.rel (!%p22_p10) target bundleno = 8 (0x8), region = 109 }
 0x2a4   :  { %539 = vsyncpa [#allocation3], 1 }
 0x2a5   :  { %541 = vsyncpa [#allocation3 + $0x1], 1 }
 0x2a6   :  { %542 = vsyncpa [#allocation6], 1 }
 0x2a7   :  { %543 = vsyncpa [#allocation4], 1 }
 0x2a8   :  { %545 = vsyncpa [#allocation4 + $0x1], 1 }
 0x2a9   :  { %546 = vsyncpa [#allocation9], 1 }
 0x2aa   :  { %548 = vsyncpa [#allocation9 + $0x1], 1 }

</bundles_post_ra>
